<compile_context>
chip_gen: v7x
topology: tpu7x:2x2x1
jax: 0.10.0
libtpu: 0.0.40
codegen_flags: <defaults>
</compile_context>

<pallas_src>
import functools

import jax
import jax.numpy as jnp
from jax.experimental import pallas as pl
from jax.experimental.pallas import tpu as pltpu


def _round_up(x, m):
    return ((x + m - 1) // m) * m


def _pad_gate_cols(w, h, hp):
    """(rows, 4*h) -> (rows, 4*hp): gate block k is placed at [k*hp, k*hp+h)."""
    if h == hp:
        return w
    blocks = [
        jnp.pad(w[:, k * h:(k + 1) * h], ((0, 0), (0, hp - h)))
        for k in range(4)
    ]
    return jnp.concatenate(blocks, axis=1)


def _fused_lstm_kernel(x0_ref, w_ih0_ref, h_ref, c_ref, w_ref, b_ref,
                       h_out_ref, c_out_ref, xh_carry, xg_scratch, *,
                       hidden_pad):
    """One grid step == one LSTM layer (seq_len == 1).

    x0_ref:    (Bp, Dp)         f32   layer-0 input, zero-padded, resident
    w_ih0_ref: (Dp, 4*Hp)       bf16  layer-0 W_ih, resident
    h_ref:     (1, Bp, Hp)      f32   this layer's incoming hidden state
    c_ref:     (1, Bp, Hp)      f32   this layer's incoming cell state
    w_ref:     (1, 2*Hp, 4*Hp)  bf16  fused [W_ih ; W_hh] (layer 0: ih half = 0)
    b_ref:     (1, 1, 4*Hp)     f32   b_ih + b_hh, gate-block padded
    h_out_ref/c_out_ref: (1, Bp, Hp) f32
    xh_carry:  (Bp, 2*Hp)       f32   fused [x | h] activation / layer carry
    xg_scratch:(Bp, 4*Hp)       f32   layer-0 x-gate partial
    """
    layer = pl.program_id(0)
    hp = hidden_pad

    # Current layer's recurrent state goes into the tail half of the fused
    # [x | h] operand (single MXU contraction against [W_ih ; W_hh]).
    xh_carry[:, hp:2 * hp] = h_ref[0]

    @pl.when(layer == 0)
    def _():
        # Layer 0: the x-contribution uses the resident layer-0 input and its
        # own W_ih (its padded width may differ from hp).  The x-half of the
        # carry is zeroed; layer 0's ih rows of w_ref are zero as well.
        xh_carry[:, 0:hp] = jnp.zeros((xh_carry.shape[0], hp), jnp.float32)
        xg_scratch[...] = jnp.dot(x0_ref[...].astype(jnp.bfloat16),
                                  w_ih0_ref[...],
                                  preferred_element_type=jnp.float32)

    @pl.when(layer > 0)
    def _():
        xg_scratch[...] = jnp.zeros_like(xg_scratch)

    # gates = [x | h] @ [W_ih ; W_hh] (+ layer-0 partial) + b  -> (Bp, 4*Hp)
    gates = (xg_scratch[...]
             + jnp.dot(xh_carry[...].astype(jnp.bfloat16), w_ref[0],
                       preferred_element_type=jnp.float32)
             + b_ref[0])

    c = c_ref[0]
    i_g = jax.nn.sigmoid(gates[:, 0 * hp:1 * hp])
    f_g = jax.nn.sigmoid(gates[:, 1 * hp:2 * hp])
    g_g = jnp.tanh(gates[:, 2 * hp:3 * hp])
    o_g = jax.nn.sigmoid(gates[:, 3 * hp:4 * hp])

    c_new = f_g * c + i_g * g_g
    h_new = o_g * jnp.tanh(c_new)

    h_out_ref[0] = h_new
    c_out_ref[0] = c_new
    # Next layer's input is this layer's hidden output (padded cols stay zero).
    xh_carry[:, 0:hp] = h_new


def decoder_lstm_step(x0, w_ih0, hidden, cell, w_cat, b_stack):
    """All n_layers LSTM cells for one time step in a single pallas_call."""
    n_layers, b_pad, h_pad = hidden.shape
    d_pad = x0.shape[1]
    g = 4 * h_pad

    kernel = functools.partial(_fused_lstm_kernel, hidden_pad=h_pad)

    # VMEM budget derived from the actual block sizes: double-buffered
    # per-layer blocks + once-resident layer-0 blocks + scratch, with headroom.
    per_layer = 2 * (4 * b_pad * h_pad * 4          # h, c, h_out, c_out (f32)
                     + 2 * h_pad * g * 2            # fused [W_ih; W_hh] (bf16)
                     + 8 * g * 4)                   # bias (sublane-padded)
    resident = 2 * (b_pad * d_pad * 4 + d_pad * g * 2)   # x0, W_ih(layer 0)
    scratch = b_pad * 2 * h_pad * 4 + b_pad * g * 4
    vmem_limit = min(64 * 1024 * 1024,
                     max(16 * 1024 * 1024,
                         2 * (per_layer + resident + scratch)))

    h_out, c_out = pl.pallas_call(
        kernel,
        out_shape=(
            jax.ShapeDtypeStruct((n_layers, b_pad, h_pad), jnp.float32),
            jax.ShapeDtypeStruct((n_layers, b_pad, h_pad), jnp.float32),
        ),
        grid_spec=pltpu.PrefetchScalarGridSpec(
            num_scalar_prefetch=0,
            grid=(n_layers,),
            in_specs=[
                pl.BlockSpec((b_pad, d_pad), lambda l: (0, 0)),        # x0 (resident)
                pl.BlockSpec((d_pad, g), lambda l: (0, 0)),            # W_ih layer 0 (resident)
                pl.BlockSpec((1, b_pad, h_pad), lambda l: (l, 0, 0)),  # hidden
                pl.BlockSpec((1, b_pad, h_pad), lambda l: (l, 0, 0)),  # cell
                pl.BlockSpec((1, 2 * h_pad, g), lambda l: (l, 0, 0)),  # [W_ih; W_hh]
                pl.BlockSpec((1, 1, g), lambda l: (l, 0, 0)),          # bias
            ],
            out_specs=(
                pl.BlockSpec((1, b_pad, h_pad), lambda l: (l, 0, 0)),
                pl.BlockSpec((1, b_pad, h_pad), lambda l: (l, 0, 0)),
            ),
            scratch_shapes=[
                pltpu.VMEM((b_pad, 2 * h_pad), jnp.float32),   # [x | h] carry
                pltpu.VMEM((b_pad, g), jnp.float32),           # layer-0 x-gate partial
            ],
        ),
        compiler_params=pltpu.CompilerParams(
            dimension_semantics=("arbitrary",),   # layers are sequential
            vmem_limit_bytes=vmem_limit,
        ),
    )(x0, w_ih0, hidden, cell, w_cat, b_stack)
    return h_out, c_out


class Decoder:
    """JAX/Pallas equivalent of the PyTorch Decoder (eval-mode semantics)."""

    def __init__(self, input_dim, hidden_dim, n_layers, p, key):
        self.output_dim = input_dim
        self.input_dim = input_dim
        self.hidden_dim = hidden_dim
        self.n_layers = n_layers
        self.p = p  # TODO(synk): dropout not applied (eval mode)

        hp = _round_up(hidden_dim, 128)
        dp0 = _round_up(input_dim, 128)   # only layer 0's W_ih uses this width
        self.hidden_pad = hp
        self.in_pad = dp0

        # Same init distribution as nn.LSTM: U(-1/sqrt(H), 1/sqrt(H)).
        bound = 1.0 / float(hidden_dim) ** 0.5
        raw_params = []
        w_cat_list, b_list = [], []
        w_ih0_pad = None
        for layer in range(n_layers):
            in_dim = input_dim if layer == 0 else hidden_dim
            key, k1, k2, k3, k4 = jax.random.split(key, 5)
            w_ih = jax.random.uniform(k1, (in_dim, 4 * hidden_dim),
                                      jnp.float32, -bound, bound)
            w_hh = jax.random.uniform(k2, (hidden_dim, 4 * hidden_dim),
                                      jnp.float32, -bound, bound)
            b_ih = jax.random.uniform(k3, (4 * hidden_dim,),
                                      jnp.float32, -bound, bound)
            b_hh = jax.random.uniform(k4, (4 * hidden_dim,),
                                      jnp.float32, -bound, bound)
            b = b_ih + b_hh
            raw_params.append((w_ih, w_hh, b))

            w_hh_p = _pad_gate_cols(w_hh, hidden_dim, hp)
            w_hh_p = jnp.pad(w_hh_p, ((0, hp - hidden_dim), (0, 0)))
            if layer == 0:
                # Layer 0's W_ih is a separate, once-resident operand; the
                # fused [W_ih; W_hh] block's ih half is zero for layer 0.
                w_ih0 = _pad_gate_cols(w_ih, hidden_dim, hp)
                w_ih0_pad = jnp.pad(
                    w_ih0, ((0, dp0 - in_dim), (0, 0))).astype(jnp.bfloat16)
                w_ih_p = jnp.zeros((hp, 4 * hp), jnp.float32)
            else:
                w_ih_p = _pad_gate_cols(w_ih, hidden_dim, hp)
                w_ih_p = jnp.pad(w_ih_p, ((0, hp - hidden_dim), (0, 0)))
            w_cat_list.append(
                jnp.concatenate([w_ih_p, w_hh_p], axis=0).astype(jnp.bfloat16))
            b_list.append(_pad_gate_cols(b[None, :], hidden_dim, hp))

        self.params = raw_params                   # f32, for the reference
        self.w_ih0 = w_ih0_pad                     # (dp0, 4*hp)    bf16
        self.w_cat = jnp.stack(w_cat_list, 0)      # (L, 2*hp, 4*hp) bf16
        self.b_stack = jnp.stack(b_list, 0)        # (L, 1, 4*hp)    f32

    def __call__(self, inp, hidden, cell):
        """inp: (B, input_dim); hidden, cell: (n_layers, B, hidden_dim)."""
        batch = inp.shape[0]
        h = self.hidden_dim
        hp, dp0 = self.hidden_pad, self.in_pad
        bp = _round_up(max(batch, 8), 8)

        # TODO(synk): in a multi-step decode loop keep state pre-padded across
        # steps (input_output_aliases) so these pads/slices leave the hot path.
        x0 = jnp.pad(inp.astype(jnp.float32),
                     ((0, bp - batch), (0, dp0 - inp.shape[1])))
        h0 = jnp.pad(hidden.astype(jnp.float32),
                     ((0, 0), (0, bp - batch), (0, hp - h)))
        c0 = jnp.pad(cell.astype(jnp.float32),
                     ((0, 0), (0, bp - batch), (0, hp - h)))

        h_out, c_out = decoder_lstm_step(x0, self.w_ih0, h0, c0,
                                         self.w_cat, self.b_stack)

        h_new = h_out[:, :batch, :h]
        c_new = c_out[:, :batch, :h]
        output = h_new[-1]
        return output, (h_new, c_new)


def _reference_forward(decoder, inp, hidden, cell):
    """Pure-JAX reference (mirrors the kernel's bf16 matmul / f32 accumulate)."""
    x = inp
    h_dim = decoder.hidden_dim
    new_h, new_c = [], []
    for layer in range(decoder.n_layers):
        w_ih, w_hh, b = decoder.params[layer]
        gates = (
            jnp.dot(x.astype(jnp.bfloat16), w_ih.astype(jnp.bfloat16),
                    preferred_element_type=jnp.float32)
            + jnp.dot(hidden[layer].astype(jnp.bfloat16),
                      w_hh.astype(jnp.bfloat16),
                      preferred_element_type=jnp.float32)
            + b
        )
        i_g = jax.nn.sigmoid(gates[:, 0 * h_dim:1 * h_dim])
        f_g = jax.nn.sigmoid(gates[:, 1 * h_dim:2 * h_dim])
        g_g = jnp.tanh(gates[:, 2 * h_dim:3 * h_dim])
        o_g = jax.nn.sigmoid(gates[:, 3 * h_dim:4 * h_dim])
        c_l = f_g * cell[layer] + i_g * g_g
        h_l = o_g * jnp.tanh(c_l)
        new_h.append(h_l)
        new_c.append(c_l)
        x = h_l
    return x, (jnp.stack(new_h, 0), jnp.stack(new_c, 0))


if __name__ == "__main__":
    batch = 4
    input_dim = 16
    hidden_dim = 32
    n_layers = 2
    p = 0.0

    key = jax.random.PRNGKey(0)
    key, kp, kx, kh, kc = jax.random.split(key, 5)

    decoder = Decoder(input_dim, hidden_dim, n_layers, p, kp)

    inp = jax.random.normal(kx, (batch, input_dim), jnp.float32)
    hidden = jax.random.normal(kh, (n_layers, batch, hidden_dim), jnp.float32)
    cell = jax.random.normal(kc, (n_layers, batch, hidden_dim), jnp.float32)

    out, (h_new, c_new) = decoder(inp, hidden, cell)
    jax.block_until_ready((out, h_new, c_new))

    ref_out, (ref_h, ref_c) = _reference_forward(decoder, inp, hidden, cell)
    assert out.shape == (batch, hidden_dim)
    assert h_new.shape == (n_layers, batch, hidden_dim)
    assert c_new.shape == (n_layers, batch, hidden_dim)
    # bf16 matmul path -> slightly looser tolerance than pure-f32.
    assert jnp.allclose(out, ref_out, atol=5e-3, rtol=5e-3)
    assert jnp.allclose(h_new, ref_h, atol=5e-3, rtol=5e-3)
    assert jnp.allclose(c_new, ref_c, atol=5e-3, rtol=5e-3)

    print("KERNEL_OK")
</pallas_src>

<mosaic_0001>
module attributes {stable_mosaic.version = 11 : i64} {
  func.func @_fused_lstm_kernel(%arg0: i32, %arg1: memref<8x128xf32, #tpu.memory_space<vmem>>, %arg2: memref<128x512xbf16, #tpu.memory_space<vmem>>, %arg3: memref<1x8x128xf32, #tpu.memory_space<vmem>>, %arg4: memref<1x8x128xf32, #tpu.memory_space<vmem>>, %arg5: memref<1x256x512xbf16, #tpu.memory_space<vmem>>, %arg6: memref<1x1x512xf32, #tpu.memory_space<vmem>>, %arg7: memref<1x8x128xf32, #tpu.memory_space<vmem>>, %arg8: memref<1x8x128xf32, #tpu.memory_space<vmem>>, %arg9: memref<8x256xf32, #tpu.memory_space<vmem>>, %arg10: memref<8x512xf32, #tpu.memory_space<vmem>>) attributes {dimension_semantics = [#tpu.dimension_semantics<arbitrary>], iteration_bounds = array<i64: 2>, scalar_prefetch = 0 : i64, scratch_operands = 2 : i64, tpu.core_type = #tpu.core_type<tc>, window_params = [{pipeline_mode = #tpu.pipeline_mode<synchronous>, transform_indices = @transform_0, window_bounds = array<i64: 8, 128>}, {pipeline_mode = #tpu.pipeline_mode<synchronous>, transform_indices = @transform_1, window_bounds = array<i64: 128, 512>}, {transform_indices = @transform_2, window_bounds = array<i64: 1, 8, 128>}, {transform_indices = @transform_3, window_bounds = array<i64: 1, 8, 128>}, {transform_indices = @transform_4, window_bounds = array<i64: 1, 256, 512>}, {transform_indices = @transform_5, window_bounds = array<i64: 1, 1, 512>}, {transform_indices = @transform_6, window_bounds = array<i64: 1, 8, 128>}, {transform_indices = @transform_7, window_bounds = array<i64: 1, 8, 128>}]} {
    %c0 = arith.constant 0 : index
    %c0_0 = arith.constant 0 : index
    %c0_1 = arith.constant 0 : index
    %0 = vector.load %arg3[%c0, %c0_0, %c0_1] : memref<1x8x128xf32, #tpu.memory_space<vmem>>, vector<1x8x128xf32>
    %1 = vector.shape_cast %0 : vector<1x8x128xf32> to vector<8x128xf32>
    %c0_2 = arith.constant 0 : index
    %c128 = arith.constant 128 : index
    %2 = vector.load %arg9[%c0_2, %c128] : memref<8x256xf32, #tpu.memory_space<vmem>>, vector<8x128xf32>
    tpu.vector_store %arg9[%c0_2, %c128], %1 {strides = array<i32>} : memref<8x256xf32, #tpu.memory_space<vmem>>, vector<8x128xf32>,
    %c0_i32 = arith.constant 0 : i32
    %3 = arith.cmpi eq, %arg0, %c0_i32 : i32
    %4 = arith.extui %3 : i1 to i32
    %c0_i32_3 = arith.constant 0 : i32
    %5 = arith.cmpi ne, %4, %c0_i32_3 : i32
    scf.if %5 {
      %cst_30 = arith.constant 0.000000e+00 : f32
      %54 = vector.broadcast %cst_30 : f32 to vector<8x128xf32>
      %c0_31 = arith.constant 0 : index
      %c0_32 = arith.constant 0 : index
      %55 = vector.load %arg9[%c0_31, %c0_32] : memref<8x256xf32, #tpu.memory_space<vmem>>, vector<8x128xf32>
      tpu.vector_store %arg9[%c0_31, %c0_32], %54 {strides = array<i32>} : memref<8x256xf32, #tpu.memory_space<vmem>>, vector<8x128xf32>,
      %c0_33 = arith.constant 0 : index
      %c0_34 = arith.constant 0 : index
      %56 = vector.load %arg1[%c0_33, %c0_34] : memref<8x128xf32, #tpu.memory_space<vmem>>, vector<8x128xf32>
      %57 = arith.truncf %56 : vector<8x128xf32> to vector<8x128xbf16>
      %c0_35 = arith.constant 0 : index
      %c0_36 = arith.constant 0 : index
      %58 = vector.load %arg2[%c0_35, %c0_36] : memref<128x512xbf16, #tpu.memory_space<vmem>>, vector<128x512xbf16>
      %cst_37 = arith.constant dense<0.000000e+00> : vector<8x512xf32>
      %59 = tpu.matmul %57, %58, %cst_37 {dimension_numbers = #tpu.dot_dimension_numbers<[1], [0], [0], [1], [0, 0, 1, 1], [], []>} : vector<8x128xbf16>, vector<128x512xbf16>, vector<8x512xf32> -> vector<8x512xf32>
      %c0_38 = arith.constant 0 : index
      %c0_39 = arith.constant 0 : index
      %60 = vector.load %arg10[%c0_38, %c0_39] : memref<8x512xf32, #tpu.memory_space<vmem>>, vector<8x512xf32>
      tpu.vector_store %arg10[%c0_38, %c0_39], %59 {strides = array<i32>} : memref<8x512xf32, #tpu.memory_space<vmem>>, vector<8x512xf32>,
    } else {
    }
    %c0_i32_4 = arith.constant 0 : i32
    %6 = arith.cmpi sgt, %arg0, %c0_i32_4 : i32
    %7 = arith.extui %6 : i1 to i32
    %c0_i32_5 = arith.constant 0 : i32
    %8 = arith.cmpi ne, %7, %c0_i32_5 : i32
    scf.if %8 {
      %cst_30 = arith.constant 0.000000e+00 : f32
      %54 = vector.broadcast %cst_30 : f32 to vector<8x512xf32>
      %c0_31 = arith.constant 0 : index
      %c0_32 = arith.constant 0 : index
      %55 = vector.load %arg10[%c0_31, %c0_32] : memref<8x512xf32, #tpu.memory_space<vmem>>, vector<8x512xf32>
      tpu.vector_store %arg10[%c0_31, %c0_32], %54 {strides = array<i32>} : memref<8x512xf32, #tpu.memory_space<vmem>>, vector<8x512xf32>,
    } else {
    }
    %c0_6 = arith.constant 0 : index
    %c0_7 = arith.constant 0 : index
    %9 = vector.load %arg10[%c0_6, %c0_7] : memref<8x512xf32, #tpu.memory_space<vmem>>, vector<8x512xf32>
    %c0_8 = arith.constant 0 : index
    %c0_9 = arith.constant 0 : index
    %10 = vector.load %arg9[%c0_8, %c0_9] : memref<8x256xf32, #tpu.memory_space<vmem>>, vector<8x256xf32>
    %11 = arith.truncf %10 : vector<8x256xf32> to vector<8x256xbf16>
    %c0_10 = arith.constant 0 : index
    %c0_11 = arith.constant 0 : index
    %c0_12 = arith.constant 0 : index
    %12 = vector.load %arg5[%c0_10, %c0_11, %c0_12] : memref<1x256x512xbf16, #tpu.memory_space<vmem>>, vector<1x256x512xbf16>
    %13 = vector.shape_cast %12 : vector<1x256x512xbf16> to vector<256x512xbf16>
    %cst = arith.constant dense<0.000000e+00> : vector<8x512xf32>
    %14 = tpu.matmul %11, %13, %cst {dimension_numbers = #tpu.dot_dimension_numbers<[1], [0], [0], [1], [0, 0, 1, 1], [], []>} : vector<8x256xbf16>, vector<256x512xbf16>, vector<8x512xf32> -> vector<8x512xf32>
    %15 = arith.addf %9, %14 : vector<8x512xf32>
    %c0_13 = arith.constant 0 : index
    %c0_14 = arith.constant 0 : index
    %c0_15 = arith.constant 0 : index
    %16 = vector.load %arg6[%c0_13, %c0_14, %c0_15] : memref<1x1x512xf32, #tpu.memory_space<vmem>>, vector<1x1x512xf32>
    %17 = vector.shape_cast %16 : vector<1x1x512xf32> to vector<1x512xf32>
    %18 = vector.broadcast %17 : vector<1x512xf32> to vector<8x512xf32>
    %19 = arith.addf %15, %18 : vector<8x512xf32>
    %c0_16 = arith.constant 0 : index
    %c0_17 = arith.constant 0 : index
    %c0_18 = arith.constant 0 : index
    %20 = vector.load %arg4[%c0_16, %c0_17, %c0_18] : memref<1x8x128xf32, #tpu.memory_space<vmem>>, vector<1x8x128xf32>
    %21 = vector.shape_cast %20 : vector<1x8x128xf32> to vector<8x128xf32>
    %22 = vector.extract_strided_slice %19 {offsets = [0, 0], sizes = [8, 128], strides = [1, 1]} : vector<8x512xf32> to vector<8x128xf32>
    %23 = arith.negf %22 : vector<8x128xf32>
    %24 = math.exp %23 : vector<8x128xf32>
    %cst_19 = arith.constant 1.000000e+00 : f32
    %25 = vector.broadcast %cst_19 : f32 to vector<8x128xf32>
    %26 = arith.addf %25, %24 : vector<8x128xf32>
    %27 = arith.divf %25, %26 : vector<8x128xf32>
    %28 = vector.extract_strided_slice %19 {offsets = [0, 128], sizes = [8, 128], strides = [1, 1]} : vector<8x512xf32> to vector<8x128xf32>
    %29 = arith.negf %28 : vector<8x128xf32>
    %30 = math.exp %29 : vector<8x128xf32>
    %cst_20 = arith.constant 1.000000e+00 : f32
    %31 = vector.broadcast %cst_20 : f32 to vector<8x128xf32>
    %32 = arith.addf %31, %30 : vector<8x128xf32>
    %33 = arith.divf %31, %32 : vector<8x128xf32>
    %34 = vector.extract_strided_slice %19 {offsets = [0, 256], sizes = [8, 128], strides = [1, 1]} : vector<8x512xf32> to vector<8x128xf32>
    %35 = math.tanh %34 : vector<8x128xf32>
    %36 = vector.extract_strided_slice %19 {offsets = [0, 384], sizes = [8, 128], strides = [1, 1]} : vector<8x512xf32> to vector<8x128xf32>
    %37 = arith.negf %36 : vector<8x128xf32>
    %38 = math.exp %37 : vector<8x128xf32>
    %cst_21 = arith.constant 1.000000e+00 : f32
    %39 = vector.broadcast %cst_21 : f32 to vector<8x128xf32>
    %40 = arith.addf %39, %38 : vector<8x128xf32>
    %41 = arith.divf %39, %40 : vector<8x128xf32>
    %42 = arith.mulf %33, %21 : vector<8x128xf32>
    %43 = arith.mulf %27, %35 : vector<8x128xf32>
    %44 = arith.addf %42, %43 : vector<8x128xf32>
    %45 = math.tanh %44 : vector<8x128xf32>
    %46 = arith.mulf %41, %45 : vector<8x128xf32>
    %c0_22 = arith.constant 0 : index
    %c0_23 = arith.constant 0 : index
    %c0_24 = arith.constant 0 : index
    %47 = vector.load %arg7[%c0_22, %c0_23, %c0_24] : memref<1x8x128xf32, #tpu.memory_space<vmem>>, vector<1x8x128xf32>
    %48 = vector.shape_cast %47 : vector<1x8x128xf32> to vector<8x128xf32>
    %49 = vector.shape_cast %46 : vector<8x128xf32> to vector<1x8x128xf32>
    tpu.vector_store %arg7[%c0_22, %c0_23, %c0_24], %49 {strides = array<i32>} : memref<1x8x128xf32, #tpu.memory_space<vmem>>, vector<1x8x128xf32>,
    %c0_25 = arith.constant 0 : index
    %c0_26 = arith.constant 0 : index
    %c0_27 = arith.constant 0 : index
    %50 = vector.load %arg8[%c0_25, %c0_26, %c0_27] : memref<1x8x128xf32, #tpu.memory_space<vmem>>, vector<1x8x128xf32>
    %51 = vector.shape_cast %50 : vector<1x8x128xf32> to vector<8x128xf32>
    %52 = vector.shape_cast %44 : vector<8x128xf32> to vector<1x8x128xf32>
    tpu.vector_store %arg8[%c0_25, %c0_26, %c0_27], %52 {strides = array<i32>} : memref<1x8x128xf32, #tpu.memory_space<vmem>>, vector<1x8x128xf32>,
    %c0_28 = arith.constant 0 : index
    %c0_29 = arith.constant 0 : index
    %53 = vector.load %arg9[%c0_28, %c0_29] : memref<8x256xf32, #tpu.memory_space<vmem>>, vector<8x128xf32>
    tpu.vector_store %arg9[%c0_28, %c0_29], %46 {strides = array<i32>} : memref<8x256xf32, #tpu.memory_space<vmem>>, vector<8x128xf32>,
    return
  }
  func.func @transform_0(%arg0: i32) -> (i32, i32) {
    %c0_i32 = arith.constant 0 : i32
    %c0_i32_0 = arith.constant 0 : i32
    %c0_i32_1 = arith.constant 0 : i32
    return %c0_i32, %c0_i32_0 : i32, i32
  }
  func.func @transform_1(%arg0: i32) -> (i32, i32) {
    %c0_i32 = arith.constant 0 : i32
    %c0_i32_0 = arith.constant 0 : i32
    %c0_i32_1 = arith.constant 0 : i32
    return %c0_i32, %c0_i32_0 : i32, i32
  }
  func.func @transform_2(%arg0: i32) -> (i32, i32, i32) {
    %c0_i32 = arith.constant 0 : i32
    %c0_i32_0 = arith.constant 0 : i32
    %c0_i32_1 = arith.constant 0 : i32
    return %arg0, %c0_i32, %c0_i32_0 : i32, i32, i32
  }
  func.func @transform_3(%arg0: i32) -> (i32, i32, i32) {
    %c0_i32 = arith.constant 0 : i32
    %c0_i32_0 = arith.constant 0 : i32
    %c0_i32_1 = arith.constant 0 : i32
    return %arg0, %c0_i32, %c0_i32_0 : i32, i32, i32
  }
  func.func @transform_4(%arg0: i32) -> (i32, i32, i32) {
    %c0_i32 = arith.constant 0 : i32
    %c0_i32_0 = arith.constant 0 : i32
    %c0_i32_1 = arith.constant 0 : i32
    return %arg0, %c0_i32, %c0_i32_0 : i32, i32, i32
  }
  func.func @transform_5(%arg0: i32) -> (i32, i32, i32) {
    %c0_i32 = arith.constant 0 : i32
    %c0_i32_0 = arith.constant 0 : i32
    %c0_i32_1 = arith.constant 0 : i32
    return %arg0, %c0_i32, %c0_i32_0 : i32, i32, i32
  }
  func.func @transform_6(%arg0: i32) -> (i32, i32, i32) {
    %c0_i32 = arith.constant 0 : i32
    %c0_i32_0 = arith.constant 0 : i32
    %c0_i32_1 = arith.constant 0 : i32
    return %arg0, %c0_i32, %c0_i32_0 : i32, i32, i32
  }
  func.func @transform_7(%arg0: i32) -> (i32, i32, i32) {
    %c0_i32 = arith.constant 0 : i32
    %c0_i32_0 = arith.constant 0 : i32
    %c0_i32_1 = arith.constant 0 : i32
    return %arg0, %c0_i32, %c0_i32_0 : i32, i32, i32
  }
}

</mosaic_0001>

<bundles_post_ra>
// kernel: tpu_custom_call.1
= control target key start
LH: loop header
LB: loop body
LE: loop exit
PB: predicated region body
PF: predicated region fallthrough
CT: control target
= control target key end

     0   :  { %s2570_s0 = inlined_call_operand.hbm [shape: f32[8,128], index: 0, kind: input, shape index: {}]   ;;  %s2571_s1 = inlined_call_operand.hbm [shape: bf16[128,512], index: 1, kind: input, shape index: {}]   ;;  %s2572_s2 = inlined_call_operand.hbm [shape: f32[2,8,128], index: 2, kind: input, shape index: {}]   ;;  %s2573_s3 = inlined_call_operand.hbm [shape: f32[2,8,128], index: 3, kind: input, shape index: {}]   ;;  %s2574_s4 = inlined_call_operand.hbm [shape: bf16[2,256,512], index: 4, kind: input, shape index: {}]   ;;  %s2575_s5 = inlined_call_operand.vmem [shape: f32[2,1,512], index: 5, kind: input, shape index: {}]   ;;  %s2576_s6 = inlined_call_operand.hbm [shape: f32[2,8,128], index: 6, kind: output, shape index: {0}]   ;;  %s2577_s7 = inlined_call_operand.hbm [shape: f32[2,8,128], index: 7, kind: output, shape index: {1}]  }
   0x1   :  { %2594 = sst [smem:[#allocation23_spill]] %s2570_s0 }
   0x2   :  { %2595 = sst [smem:[#allocation24_spill]] %s2572_s2 }
   0x3   :  { %13 = vsyncpa [#allocation5], 0 }
   0x4   :  { %14 = vsyncpa [#allocation8], 0 }
   0x5   :  { %15 = vsyncpa [#allocation6], 0 }
   0x6   :  { %17 = vsyncpa [#allocation6 + $0x1], 0 }
   0x7   :  { %18 = vsyncpa [#allocation14], 0 }
   0x8   :  { %20 = vsyncpa [#allocation14 + $0x1], 0  ;;  %s2133_s24 = smov 0   ;;  %s2135_s25 = smov 0  }
   0x9   :  { %s2137_s26 = smov 0   ;;  %s2139_s27 = smov 0  }
   0xa LB: > { %2596 = sst [smem:[#allocation20_spill]] %s2075_s26  ;;  %s2154_s28 = sadd.s32 4294967295, %s2079_s27   ;;  %s2079_s27 = sphi %s2139_s27, %s2630_s27   ;;  %s2075_s26 = sphi %s2137_s26, %s2632_s26   ;;  %s2071_s25 = sphi %s2135_s25, %s2634_s25   ;;  %s2067_s24 = sphi %s2133_s24, %s2633_s24  }
   0xb   : > { %s1451_s29 = sadd.s32 4294967294, %s2079_s27   ;;  %s2158_s30 = sadd.s32 1, %s2079_s27  }
   0xc   : > { %2597 = sst [smem:[#allocation21_spill]] %s2158_s30  ;;  %s75_s8 = sadd.s32 1, %s2075_s26 }
   0xd   : > { %s72_s9 = ssub.s32 %s2079_s27, %s2158_s30  ;;  %p2578_p0 = scmp.ne.s32.totalorder %s2075_s26, %s2071_s25 }
   0xe   : > { %p73_p1 = scmp.eq.s32.totalorder %s72_s9, 0  ;;  %p88_p2 = scmp.ne.s32.totalorder %s2071_s25, %s2067_s24 }
   0xf   : > { %p2579_p3 = scmp.eq.s32.totalorder %s2154_s28, 0  ;;  %p190_p4 = scmp.eq.s32.totalorder %s2154_s28, 1 }
  0x10   : > { %s2170_s10 = scalar_select %p73_p1, %s2075_s26, %s75_s8  }
  0x11   : > { %p2174_p5 = por %p2579_p3, %p88_p2  ;;  %p2181_p6 = por %p190_p4, %p2578_p0 }
  0x12   : > { %2598 = sst [smem:[#allocation22_spill]] %s2170_s10  ;;  %p196_p7 = scmp.eq.s32.totalorder %s1451_s29, 1 }
  0x13   : > { %s2599_s11 = scalar_select %p2174_p5, 1, 0 }
  0x14   : > { %s2600_s12 = scalar_select %p2181_p6, 1, 0 }
  0x15   : > { %p1452_p8 = scmp.ge.s32.totalorder %s2079_s27, 1  ;;  %p229_p9 = scmp.lt.s32.totalorder %s2079_s27, 3 }
  0x16   : > { %p2188_p11 = por %p196_p7, %p88_p2  ;;  %s2081_s15 = smov [#allocation4]  }
  0x17   : > { %p2192_p12 = pnand %p1452_p8, %p229_p9  ;;  %s242_s16 = sshll.u32 %s2081_s15, 4  ;;  %s243_s16 = int_to_ptr.vmem [resolvable:$true] %s242_s16 }
  0x18   : > { %s2601_s13 = scalar_select %p2188_p11, 1, 0 }
  0x19   : > { %s2602_s14 = scalar_select %p2192_p12, 1, 0 }
  0x1a   : > { %p1598_p1 = pneg %p2192_p12  ;;  %p83_p4 = scmp.eq.s32.totalorder %s2079_s27, 0 }
  0x1b   : > { %p2604_p2 = scmp.ne.s32.totalorder %s2075_s26, %s2071_s25  ;;  %s268_s20 = sand.u32 1, %s2075_s26  }
  0x1c   : > { %p2204_p10 = pnand %p1598_p1, %p2579_p3  ;;  %s2216_s21 = sshll.u32 %s268_s20, 3 }
  0x1d   : > { %p2211_p7 = por %p83_p4, %p2604_p2  ;;  %s2606_s0 = sld [smem:[#allocation23_spill]] }
  0x1e   : > { %s2603_s18 = scalar_select %p2204_p10, 1, 0 }
  0x1f   : > { %s2605_s19 = scalar_select %p2211_p7, 1, 0 }
  0x20   : > { %p2585_p9 = pneg %p2204_p10 }
  0x23   : > { %s1827_s29 = scalar_lea.hbm %s2606_s0, 128 }
  0x24   : > { %p1828_p8 = scmp.ne.s32.totalorder %s2606_s0, %s1827_s29  ;;  %p1834_p2 = scmp.lt.u32.totalorder %s1827_s29, %s2606_s0 }
  0x26   : > { %p1830_p1 = pnand %p2585_p9, %p1828_p8 }
  0x28   : > { %p1831_p4 = pneg %p1830_p1 }
  0x2a   : > { %p1836_p13 = pnand %p1834_p2, %p1831_p4 }
  0x2c   : > { %1839 = shalt.err (!%p1836_p13)
}
  0x2d   : > { %s1840_s10 = scalar_lea.vmem %s243_s16, 128  ;;  %p1848_p6 = scmp.lt.s32.totalorder %s243_s16, %s243_s16 }
  0x2e   : > { %p1841_p3 = scmp.ne.s32.totalorder %s243_s16, %s1840_s10  ;;  %p1849_p5 = scmp.lt.s32.totalorder %s1840_s10, %s1840_s10 }
  0x30   : > { %p1843_p0 = pnand %p1841_p3, %p2585_p9  ;;  %p1850_p12 = por %p1849_p5, %p1848_p6 }
  0x32   : > { %p1844_p11 = pneg %p1843_p0 }
  0x34   : > { %p1851_p7 = pnand %p1850_p12, %p1844_p11 }
  0x36   : > { %1854 = shalt.err (!%p1851_p7)
}
  0x37   : > { %1601 = dma.hbm_to_vmem [thread:$0]  (!%p2204_p10), %s2606_s0, 128, %s243_s16, [#allocation5]  }
  0x38   : > { %s2583_s17 = sshll.u32 %s2079_s27, 7  ;;  %s2607_s2 = sld [smem:[#allocation24_spill]] }
  0x39   : > { %s270_s9 = scalar_lea.vmem [#allocation9], %s2216_s21  ;;  %p2608_p0 = scmp.ne.s32.totalorder %s2605_s19, 0 }
  0x3a   : > { %s277_s15 = sshll.u32 %s270_s9, 4  ;;  %p2609_p3 = scmp.lt.s32.totalorder %s2079_s27, 2  ;;  %s2249_s15 = int_to_ptr.vmem [resolvable:$true] %s277_s15 }
  0x3b   : > { %s2259_s16 = sshll.u32 %s268_s20, 9  ;;  %s2611_s23 = sand.u32 1, %s2079_s27  }
  0x3c   : > { %p2255_p5 = pnand %p2609_p3, %p2608_p0  ;;  %s2263_s29 = scalar_lea.sflag [#allocation5], %s2611_s23 }
  0x3e   : > { %s2246_s10 = scalar_lea.hbm %s2607_s2, %s2583_s17  ;;  %p2269_p11 = pneg %p2255_p5 }
  0x3f   : > { %s2610_s22 = scalar_select %p2255_p5, 1, 0 }
  0x40   : > { %s1855_s8 = scalar_lea.hbm %s2246_s10, 128  ;;  %s1860_s0 = scalar_lea.hbm %s2607_s2, 256 }
  0x41   : > { %p1856_p6 = scmp.ne.s32.totalorder %s2246_s10, %s1855_s8  ;;  %p1861_p7 = scmp.lt.u32.totalorder %s2246_s10, %s2607_s2 }
  0x42   : > { %s2612_s17 = scalar_select %p2269_p11, 1, 0 }
  0x43   : > { %p1858_p12 = pnand %p2269_p11, %p1856_p6  ;;  %p1862_p8 = scmp.lt.u32.totalorder %s1860_s0, %s1855_s8 }
  0x44   : > { %p1864_p4 = scmp.lt.u32.totalorder %s1855_s8, %s2246_s10 }
  0x45   : > { %p1859_p13 = pneg %p1858_p12  ;;  %p1863_p1 = por %p1862_p8, %p1861_p7 }
  0x47   : > { %p1865_p2 = por %p1864_p4, %p1863_p1 }
  0x49   : > { %p1866_p0 = pnand %p1865_p2, %p1859_p13 }
  0x4b   : > { %1869 = shalt.err (!%p1866_p0)
}
  0x4c   : > { %s1870_s23 = scalar_lea.vmem %s2249_s15, 128  ;;  %s2082_s19 = smov [#allocation9]  }
  0x4d   : > { %p1871_p3 = scmp.ne.s32.totalorder %s2249_s15, %s1870_s23  ;;  %s1875_s9 = sshll.u32 %s2082_s19, 4  ;;  %s1876_s9 = int_to_ptr.vmem [resolvable:$false] %s1875_s9 }
  0x4e   : > { %s1877_s26 = scalar_lea.vmem %s1876_s9, 256  ;;  %p1878_p9 = scmp.lt.s32.totalorder %s2249_s15, %s1876_s9 }
  0x4f   : > { %p1873_p6 = pnand %p1871_p3, %p2269_p11  ;;  %p1879_p10 = scmp.lt.s32.totalorder %s1877_s26, %s1870_s23 }
  0x51   : > { %p1874_p12 = pneg %p1873_p6  ;;  %p1880_p7 = por %p1879_p10, %p1878_p9 }
  0x53   : > { %p1881_p8 = pnand %p1880_p7, %p1874_p12 }
  0x55   : > { %1884 = shalt.err (!%p1881_p8)
}
  0x56   : > { %1608 = dma.hbm_to_vmem [thread:$0]  (!%p2255_p5), %s2246_s10, 128, %s2249_s15, %s2263_s29  }
  0x57   : > { %s306_s0 = scalar_lea.vmem [#allocation11], %s2259_s16  ;;  %s2613_s20 = sshll.u32 %s2079_s27, 7 }
  0x58   : > { %s313_s8 = sshll.u32 %s306_s0, 4  ;;  %s2299_s23 = scalar_lea.hbm %s2573_s3, %s2613_s20  ;;  %s2301_s8 = int_to_ptr.vmem [resolvable:$true] %s313_s8 }
  0x59   : > { %s288_s9 = scalar_lea.vmem [#allocation10], %s2216_s21  ;;  %s1885_s30 = scalar_lea.hbm %s2299_s23, 128 }
  0x5a   : > { %s295_s26 = sshll.u32 %s288_s9, 4  ;;  %p1886_p10 = scmp.ne.s32.totalorder %s2299_s23, %s1885_s30  ;;  %s296_s26 = int_to_ptr.vmem [resolvable:$true] %s295_s26 }
  0x5b   : > { %s1890_s2 = scalar_lea.hbm %s2573_s3, 256  ;;  %p1891_p1 = scmp.lt.u32.totalorder %s2299_s23, %s2573_s3 }
  0x5c   : > { %p1888_p9 = pnand %p1886_p10, %p2269_p11  ;;  %p1892_p4 = scmp.lt.u32.totalorder %s1890_s2, %s1885_s30 }
  0x5d   : > { %p1894_p0 = scmp.lt.u32.totalorder %s1885_s30, %s2299_s23 }
  0x5e   : > { %p1889_p13 = pneg %p1888_p9  ;;  %p1893_p2 = por %p1892_p4, %p1891_p1 }
  0x60   : > { %p1895_p3 = por %p1894_p0, %p1893_p2 }
  0x62   : > { %p1896_p6 = pnand %p1895_p3, %p1889_p13 }
  0x64   : > { %1899 = shalt.err (!%p1896_p6)
}
  0x65   : > { %s1900_s21 = scalar_lea.vmem %s296_s26, 128  ;;  %s2083_s20 = smov [#allocation10]  }
  0x66   : > { %p1901_p12 = scmp.ne.s32.totalorder %s296_s26, %s1900_s21  ;;  %s1905_s19 = sshll.u32 %s2083_s20, 4  ;;  %s1906_s19 = int_to_ptr.vmem [resolvable:$false] %s1905_s19 }
  0x67   : > { %s1907_s9 = scalar_lea.vmem %s1906_s19, 256  ;;  %p1908_p10 = scmp.lt.s32.totalorder %s296_s26, %s1906_s19 }
  0x68   : > { %p1903_p7 = pnand %p1901_p12, %p2269_p11  ;;  %p1909_p9 = scmp.lt.s32.totalorder %s1907_s9, %s1900_s21 }
  0x6a   : > { %p1904_p8 = pneg %p1903_p7  ;;  %p1910_p5 = por %p1909_p9, %p1908_p10 }
  0x6c   : > { %p1911_p1 = pnand %p1910_p5, %p1904_p8 }
  0x6e   : > { %1914 = shalt.err (!%p1911_p1)
}
  0x6f   : > { %p2614_p4 = scmp.ne.s32.totalorder %s2610_s22, 0  ;;  %s2084_s30 = smov [#allocation7]  }
  0x70   : > { %s252_s10 = sshll.u32 %s2084_s30, 4  ;;  %s1915_s16 = scalar_lea.hbm %s2571_s1, 4096  ;;  %s253_s10 = int_to_ptr.vmem [resolvable:$true] %s252_s10 }
  0x71   : > { %1611 = dma.hbm_to_vmem [thread:$0]  (!%p2614_p4), %s2299_s23, 128, %s296_s26, %s2263_s29  }
  0x72   : > { %p1916_p13 = scmp.ne.s32.totalorder %s2571_s1, %s1915_s16  ;;  %p2615_p2 = scmp.ne.s32.totalorder %s2603_s18, 0 }
  0x73   : > { %p1922_p6 = scmp.lt.u32.totalorder %s1915_s16, %s2571_s1 }
  0x74   : > { %p2616_p5 = pneg %p2615_p2 }
  0x76   : > { %p1918_p0 = pnand %p1916_p13, %p2616_p5 }
  0x78   : > { %p1919_p3 = pneg %p1918_p0 }
  0x7a   : > { %p1924_p12 = pnand %p1922_p6, %p1919_p3 }
  0x7c   : > { %1927 = shalt.err (!%p1924_p12)
}
  0x7d   : > { %s1928_s23 = scalar_lea.vmem %s253_s10, 4096  ;;  %p2617_p8 = pmov %p2616_p5 }
  0x7e   : > { %p1929_p7 = scmp.ne.s32.totalorder %s253_s10, %s1928_s23  ;;  %p1936_p1 = scmp.lt.s32.totalorder %s253_s10, %s253_s10 }
  0x7f   : > { %p1937_p4 = scmp.lt.s32.totalorder %s1928_s23, %s1928_s23 }
  0x80   : > { %p1931_p10 = pnand %p1929_p7, %p2617_p8 }
  0x81   : > { %p1938_p11 = por %p1937_p4, %p1936_p1 }
  0x82   : > { %p1932_p9 = pneg %p1931_p10 }
  0x84   : > { %p1939_p5 = pnand %p1938_p11, %p1932_p9 }
  0x86   : > { %1942 = shalt.err (!%p1939_p5)
}
  0x87   : > { %s2085_s26 = smov 256   ;;  %s2086_s9 = smov 16  }
  0x88   : > { %1604 = dma.hbm_to_vmem [thread:$0]  (!%p2615_p2), %s2571_s1, 4096, %s253_s10, [#allocation8], %s2085_s26, %s2085_s26, %s2086_s9  }
  0x89   : > { %s1579_s2 = sshll.u32 %s2079_s27, 13  ;;  %p2618_p4 = scmp.ne.s32.totalorder %s2612_s17, 0 }
  0x8a   : > { %s2349_s20 = scalar_lea.hbm %s2574_s4, %s1579_s2  ;;  %s1948_s23 = scalar_lea.hbm %s2574_s4, 16384 }
  0x8b   : > { %s1943_s21 = scalar_lea.hbm %s2349_s20, 8192  ;;  %p1949_p2 = scmp.lt.u32.totalorder %s2349_s20, %s2574_s4 }
  0x8c   : > { %p1944_p11 = scmp.ne.s32.totalorder %s2349_s20, %s1943_s21  ;;  %p1950_p3 = scmp.lt.u32.totalorder %s1948_s23, %s1943_s21 }
  0x8d   : > { %p1952_p12 = scmp.lt.u32.totalorder %s1943_s21, %s2349_s20 }
  0x8e   : > { %p1946_p13 = pnand %p1944_p11, %p2618_p4  ;;  %p1951_p6 = por %p1950_p3, %p1949_p2 }
  0x90   : > { %p1947_p0 = pneg %p1946_p13  ;;  %p1953_p7 = por %p1952_p12, %p1951_p6 }
  0x92   : > { %p1954_p8 = pnand %p1953_p7, %p1947_p0 }
  0x94   : > { %1957 = shalt.err (!%p1954_p8)
}
  0x95   : > { %s1958_s15 = scalar_lea.vmem %s2301_s8, 8192  ;;  %s2087_s2 = smov [#allocation11]  }
  0x96   : > { %p1959_p10 = scmp.ne.s32.totalorder %s2301_s8, %s1958_s15  ;;  %s1963_s16 = sshll.u32 %s2087_s2, 4  ;;  %s1964_s16 = int_to_ptr.vmem [resolvable:$false] %s1963_s16 }
  0x97   : > { %s1965_s0 = scalar_lea.vmem %s1964_s16, 16384  ;;  %p1966_p5 = scmp.lt.s32.totalorder %s2301_s8, %s1964_s16 }
  0x98   : > { %p1961_p9 = pnand %p1959_p10, %p2618_p4  ;;  %p1967_p11 = scmp.lt.s32.totalorder %s1965_s0, %s1958_s15 }
  0x9a   : > { %p1962_p1 = pneg %p1961_p9  ;;  %p1968_p13 = por %p1967_p11, %p1966_p5 }
  0x9c   : > { %p1969_p2 = pnand %p1968_p13, %p1962_p1 }
  0x9e   : > { %1972 = shalt.err (!%p1969_p2)
}
  0x9f   : > { %p2619_p0 = scmp.ne.s32.totalorder %s2610_s22, 0  ;;  %p2620_p4 = scmp.ne.s32.totalorder %s2602_s14, 0 }
  0xa0   : > { %p2621_p3 = scmp.eq.s32.totalorder (!%p2620_p4), %s2154_s28, 0 }
  0xa1   : > { %1614 = dma.hbm_to_vmem [thread:$0]  (!%p2619_p0), %s2349_s20, 8192, %s2301_s8, %s2263_s29, %s2085_s26, %s2085_s26, %s2086_s9  }
  0xa2   : > { %332 = sbr.rel (%p2620_p4) target bundleno = 791 (0x317), region = 44 }
  0xa9   : > { %2046 = dma.done.wait (%p2621_p3), [#allocation5], 128   ;;  %p2622_p6 = pmov %p2621_p3 }
  0xaa   : > { %p2623_p12 = pmov %p2621_p3 }
  0xab   : > { %2048 = vsyncadd (%p2622_p6), [#allocation5], 4294967168 }
  0xac   : > { %2050 = dma.done.wait (%p2623_p12), [#allocation8], 4096   ;;  %p2624_p7 = pmov %p2621_p3 }
  0xad   : > { %s342_s17 = sand.u32 1, %s2154_s28   ;;  %s2388_s22 = sand.u32 1, %s2071_s25  }
  0xae   : > { %2052 = vsyncadd (%p2624_p7), [#allocation8], 4294963200  ;;  %s2391_s14 = sshll.u32 %s2388_s22, 3  ;;  %s343_s29 = scalar_lea.sflag [#allocation5], %s342_s17 }
  0xaf   : > { %s346_s8 = scalar_lea.vmem [#allocation9], %s2391_s14  ;;  %p2625_p8 = scmp.ne.s32.totalorder %s2599_s11, 0 }
  0xb1   : > { %2054 = dma.done.wait (%p2625_p8), %s343_s29, 8448  }
  0xb2   : > { %2056 = vsyncadd (%p2625_p8), %s343_s29, 4294958848  ;;  %s1468_s26 = sshll.u32 %s2388_s22, 9  ;;  %p414_p10 = scmp.lt.s32.totalorder %s2154_s28, 1  ;;  %v419_v0 = vld [vmem:[%s346_s8] sm:$0xff] }
  0xb3   : > { %420 = vst [vmem:[#allocation2 + $0x8] sm:$0xff] %v419_v0  ;;  %s355_s23 = scalar_lea.vmem [#allocation10], %s2391_s14  ;;  %s2407_s11 = scalar_lea.vmem [#allocation11], %s1468_s26 }
  0xb4   : > { %s415_s9 = scalar_select %p414_p10, %s2154_s28, 1 }
  0xb5   : > { %s406_s10 = scalar_lea.vmem [#allocation12], %s2391_s14  ;;  %s413_s30 = scalar_lea.vmem [#allocation13], %s2391_s14 }
  0xb6   : > { %s1471_s20 = sshll.u32 %s415_s9, 2  ;;  %p2626_p9 = scmp.ne.s32.totalorder %s2154_s28, 0 }
  0xb7   : > { %s2404_s19 = scalar_lea.vmem %s2575_s5, %s1471_s20  ;;  %v1667_v1 = vld [vmem:[#allocation7 + $0x4] ss:$16 sps:$4 sm:$0xff] (!%p2626_p9)   ;;  %v2088_v2 = vmov (!%p2626_p9), 0.0   ;;  %v1669_v3 = vld [vmem:[#allocation7 + $0xc] ss:$16 sps:$4 sm:$0xff] (!%p2626_p9)   ;;  %v2089_v4 = vmov (!%p2626_p9), 0  }
  0xb8   : > { %424 = sbr.rel (%p2626_p9) target bundleno = 432 (0x1b0), region = 68  ;;  %425 = vst [vmem:[#allocation2] sm:$0xff] (!%p2626_p9), %v2088_v2  ;;  %652 = vmatprep.mubr.bf16.mxu0 (!%p2626_p9), %v2089_v4  ;;  %693 = vmatprep.mubr.bf16.mxu1 (!%p2626_p9), %v2089_v4  ;;  %v1671_v5 = vld [vmem:[#allocation7] ss:$16 sps:$4 sm:$0xff] (!%p2626_p9)   ;;  %v1672_v6 = vld [vmem:[#allocation7 + $0x8] ss:$16 sps:$4 sm:$0xff] (!%p2626_p9)  }
  0xb9   : > { %620 = vmatprep.subr.bf16.mxu0 (!%p2626_p9), %v1667_v1  ;;  %661 = vmatprep.subr.bf16.mxu1 (!%p2626_p9), %v1669_v3  ;;  %v1673_v7 = vld [vmem:[#allocation7 + $0x24] ss:$16 sps:$4 sm:$0xff] (!%p2626_p9)   ;;  %v1675_v8 = vld [vmem:[#allocation7 + $0x2c] ss:$16 sps:$4 sm:$0xff] (!%p2626_p9)   ;;  %v1677_v9 = vld [vmem:[#allocation7 + $0x20] ss:$16 sps:$4 sm:$0xff] (!%p2626_p9)  }
  0xba   : > { %621 = vmatpush1.bf16.msra.mxu0 (!%p2626_p9), %v1671_v5  ;;  %662 = vmatpush1.bf16.msra.mxu1 (!%p2626_p9), %v1672_v6  ;;  %v1678_v10 = vld [vmem:[#allocation7 + $0x28] ss:$16 sps:$4 sm:$0xff] (!%p2626_p9)   ;;  %v1679_v11 = vld [vmem:[#allocation7 + $0x44] ss:$16 sps:$4 sm:$0xff] (!%p2626_p9)   ;;  %v1681_v12 = vld [vmem:[#allocation7 + $0x4c] ss:$16 sps:$4 sm:$0xff] (!%p2626_p9)  }
  0xbb   : > { %622 = vmatprep.subr.bf16.mxu0 (!%p2626_p9), %v1673_v7  ;;  %663 = vmatprep.subr.bf16.mxu1 (!%p2626_p9), %v1675_v8  ;;  %v1683_v13 = vld [vmem:[#allocation7 + $0x40] ss:$16 sps:$4 sm:$0xff] (!%p2626_p9)   ;;  %v1684_v14 = vld [vmem:[#allocation7 + $0x48] ss:$16 sps:$4 sm:$0xff] (!%p2626_p9)   ;;  %v1685_v15 = vld [vmem:[#allocation7 + $0x64] ss:$16 sps:$4 sm:$0xff] (!%p2626_p9)  }
  0xbc   : > { %v1687_v16 = vld [vmem:[#allocation7 + $0x6c] ss:$16 sps:$4 sm:$0xff] (!%p2626_p9)   ;;  %v1689_v17 = vld [vmem:[#allocation7 + $0x60] ss:$16 sps:$4 sm:$0xff] (!%p2626_p9)   ;;  %v1690_v18 = vld [vmem:[#allocation7 + $0x68] ss:$16 sps:$4 sm:$0xff] (!%p2626_p9)  }
  0xbd   : > { %v1691_v19 = vld [vmem:[#allocation7 + $0x84] ss:$16 sps:$4 sm:$0xff] (!%p2626_p9)   ;;  %v1693_v20 = vld [vmem:[#allocation7 + $0x8c] ss:$16 sps:$4 sm:$0xff] (!%p2626_p9)   ;;  %v1695_v21 = vld [vmem:[#allocation7 + $0x80] ss:$16 sps:$4 sm:$0xff] (!%p2626_p9)  }
  0xbe   : > { %623 = vmatpush1.bf16.msra.mxu0 (!%p2626_p9), %v1677_v9  ;;  %664 = vmatpush1.bf16.msra.mxu1 (!%p2626_p9), %v1678_v10  ;;  %v1696_v22 = vld [vmem:[#allocation7 + $0x88] ss:$16 sps:$4 sm:$0xff] (!%p2626_p9)   ;;  %v1697_v23 = vld [vmem:[#allocation7 + $0xa4] ss:$16 sps:$4 sm:$0xff] (!%p2626_p9)   ;;  %v1699_v24 = vld [vmem:[#allocation7 + $0xac] ss:$16 sps:$4 sm:$0xff] (!%p2626_p9)  }
  0xbf   : > { %624 = vmatprep.subr.bf16.mxu0 %v1679_v11  ;;  %665 = vmatprep.subr.bf16.mxu1 %v1681_v12  ;;  %v1701_v25 = vld [vmem:[#allocation7 + $0xa0] ss:$16 sps:$4 sm:$0xff]   ;;  %v1702_v26 = vld [vmem:[#allocation7 + $0xa8] ss:$16 sps:$4 sm:$0xff]   ;;  %v1703_v27 = vld [vmem:[#allocation7 + $0xc4] ss:$16 sps:$4 sm:$0xff]  }
  0xc0   : > { %v1705_v28 = vld [vmem:[#allocation7 + $0xcc] ss:$16 sps:$4 sm:$0xff]   ;;  %v1707_v29 = vld [vmem:[#allocation7 + $0xc0] ss:$16 sps:$4 sm:$0xff]   ;;  %v1708_v30 = vld [vmem:[#allocation7 + $0xc8] ss:$16 sps:$4 sm:$0xff]  }
  0xc1   : > { %v1709_v31 = vld [vmem:[#allocation7 + $0xe4] ss:$16 sps:$4 sm:$0xff]   ;;  %v1711_v32 = vld [vmem:[#allocation7 + $0xec] ss:$16 sps:$4 sm:$0xff]   ;;  %v1713_v33 = vld [vmem:[#allocation7 + $0xe0] ss:$16 sps:$4 sm:$0xff]  }
  0xc2   : > { %625 = vmatpush1.bf16.msra.mxu0 %v1683_v13  ;;  %666 = vmatpush1.bf16.msra.mxu1 %v1684_v14  ;;  %v1714_v34 = vld [vmem:[#allocation7 + $0xe8] ss:$16 sps:$4 sm:$0xff]  }
  0xc3   : > { %626 = vmatprep.subr.bf16.mxu0 %v1685_v15  ;;  %667 = vmatprep.subr.bf16.mxu1 %v1687_v16  ;;  %v426_v35 = vld [vmem:[#allocation4] sm:$0xff] }
  0xc4   : > { %v427_v36 = vpack.c.bf16 %v426_v35, %v426_v35 }
  0xc6   : > { %627 = vmatpush1.bf16.msra.mxu0 %v1689_v17  ;;  %668 = vmatpush1.bf16.msra.mxu1 %v1690_v18 }
  0xc7   : > { %628 = vmatprep.subr.bf16.mxu0 %v1691_v19  ;;  %669 = vmatprep.subr.bf16.mxu1 %v1693_v20 }
  0xca   : > { %629 = vmatpush1.bf16.msra.mxu0 %v1695_v21  ;;  %670 = vmatpush1.bf16.msra.mxu1 %v1696_v22 }
  0xcb   : > { %630 = vmatprep.subr.bf16.mxu0 %v1697_v23  ;;  %671 = vmatprep.subr.bf16.mxu1 %v1699_v24 }
  0xce   : > { %631 = vmatpush1.bf16.msra.mxu0 %v1701_v25  ;;  %672 = vmatpush1.bf16.msra.mxu1 %v1702_v26 }
  0xcf   : > { %632 = vmatprep.subr.bf16.mxu0 %v1703_v27  ;;  %673 = vmatprep.subr.bf16.mxu1 %v1705_v28 }
  0xd2   : > { %633 = vmatpush1.bf16.msra.mxu0 %v1707_v29  ;;  %674 = vmatpush1.bf16.msra.mxu1 %v1708_v30 }
  0xd3   : > { %634 = vmatprep.subr.bf16.mxu0 %v1709_v31  ;;  %675 = vmatprep.subr.bf16.mxu1 %v1711_v32 }
  0xd6   : > { %635 = vmatpush1.bf16.msra.mxu0 %v1713_v33  ;;  %676 = vmatpush1.bf16.msra.mxu1 %v1714_v34 }
  0xd9   : > { %653 = vmatmul.mubr.bf16.vlgmr.msra.gmra.mrb[0].mxu0 %v427_v36  ;;  %694 = vmatmul.mubr.bf16.vlgmr.msra.gmra.mrb[0].mxu1 %v427_v36 }
 0x1ac   : > { %v654_v37 = vpop.f32.mrb[0].mxu0  ;;  %v695_v38 = vpop.f32.mrb[0].mxu1 }
 0x1ad   : > { %702 = vst [vmem:[#allocation3] sm:$0xff] %v654_v37  ;;  %704 = vst [vmem:[#allocation3 + $0x10] sm:$0xff] %v695_v38  ;;  %v656_v39 = vpop.f32.mrb[1].mxu0  ;;  %v697_v40 = vpop.f32.mrb[1].mxu1 }
 0x1ae   : > { %703 = vst [vmem:[#allocation3 + $0x8] sm:$0xff] %v656_v39  ;;  %705 = vst [vmem:[#allocation3 + $0x18] sm:$0xff] %v697_v40  ;;  %v658_v41 = vpop.f32.mrb[2].mxu0  ;;  %v699_v42 = vpop.f32.mrb[2].mxu1 }
 0x1af   : > { %v659_v43 = vpop.f32.mrb[3].mxu0  ;;  %v700_v44 = vpop.f32.mrb[3].mxu1 }
 0x1b0 PF: > { %p1505_p1 = scmp.le.s32.totalorder %s2154_s28, 0 }
 0x1b1   : > { %v2090_v45 = vmov (!%p1505_p1), 0.0  }
 0x1b2   : > { %709 = sbr.rel (%p1505_p1) target bundleno = 441 (0x1b9), region = 72  ;;  %710 = vst [vmem:[#allocation3] sm:$0xff] (!%p1505_p1), %v2090_v45  ;;  %711 = vst [vmem:[#allocation3 + $0x8] sm:$0xff] (!%p1505_p1), %v2090_v45 }
 0x1b3   : > { %712 = vst [vmem:[#allocation3 + $0x10] sm:$0xff] (!%p1505_p1), %v2090_v45  ;;  %713 = vst [vmem:[#allocation3 + $0x18] sm:$0xff] (!%p1505_p1), %v2090_v45 }
 0x1b9 PF: > { %v1715_v46 = vld [vmem:[%s2407_s11 + $0x4] ss:$16 sps:$4 sm:$0xff]   ;;  %v1717_v47 = vld [vmem:[%s2407_s11] ss:$16 sps:$4 sm:$0xff]   ;;  %v1726_v51 = vld [vmem:[%s2407_s11 + $0xc] ss:$16 sps:$4 sm:$0xff]  }
 0x1ba   : > { %1106 = vmatprep.subr.bf16.mxu0 %v1715_v46  ;;  %v1718_v48 = vld [vmem:[%s2407_s11 + $0x24] ss:$16 sps:$4 sm:$0xff]   ;;  %v1720_v49 = vld [vmem:[%s2407_s11 + $0x20] ss:$16 sps:$4 sm:$0xff]   ;;  %v1729_v52 = vld [vmem:[%s2407_s11 + $0x8] ss:$16 sps:$4 sm:$0xff]   ;;  %1147 = vmatprep.subr.bf16.mxu1 %v1726_v51 }
 0x1bb   : > { %1107 = vmatpush1.bf16.msra.mxu0 %v1717_v47  ;;  %v1721_v50 = vld [vmem:[%s2407_s11 + $0x44] ss:$16 sps:$4 sm:$0xff]   ;;  %v1723_v53 = vld [vmem:[%s2407_s11 + $0x40] ss:$16 sps:$4 sm:$0xff]   ;;  %1148 = vmatpush1.bf16.msra.mxu1 %v1729_v52  ;;  %v1732_v55 = vld [vmem:[%s2407_s11 + $0x2c] ss:$16 sps:$4 sm:$0xff]  }
 0x1bc   : > { %1108 = vmatprep.subr.bf16.mxu0 %v1718_v48  ;;  %v1724_v54 = vld [vmem:[%s2407_s11 + $0x64] ss:$16 sps:$4 sm:$0xff]   ;;  %v1735_v56 = vld [vmem:[%s2407_s11 + $0x28] ss:$16 sps:$4 sm:$0xff]   ;;  %1149 = vmatprep.subr.bf16.mxu1 %v1732_v55  ;;  %v1728_v57 = vld [vmem:[%s2407_s11 + $0x60] ss:$16 sps:$4 sm:$0xff]  }
 0x1bd   : > { %v1730_v58 = vld [vmem:[%s2407_s11 + $0x84] ss:$16 sps:$4 sm:$0xff]   ;;  %v1738_v59 = vld [vmem:[%s2407_s11 + $0x4c] ss:$16 sps:$4 sm:$0xff]   ;;  %v1741_v60 = vld [vmem:[%s2407_s11 + $0x48] ss:$16 sps:$4 sm:$0xff]  }
 0x1be   : > { %v1744_v61 = vld [vmem:[%s2407_s11 + $0x6c] ss:$16 sps:$4 sm:$0xff]   ;;  %v1734_v62 = vld [vmem:[%s2407_s11 + $0x80] ss:$16 sps:$4 sm:$0xff]   ;;  %v1736_v63 = vld [vmem:[%s2407_s11 + $0xa4] ss:$16 sps:$4 sm:$0xff]  }
 0x1bf   : > { %1109 = vmatpush1.bf16.msra.mxu0 %v1720_v49  ;;  %1150 = vmatpush1.bf16.msra.mxu1 %v1735_v56  ;;  %v1747_v0 = vld [vmem:[%s2407_s11 + $0x68] ss:$16 sps:$4 sm:$0xff]   ;;  %v1750_v1 = vld [vmem:[%s2407_s11 + $0x8c] ss:$16 sps:$4 sm:$0xff]   ;;  %v1740_v2 = vld [vmem:[%s2407_s11 + $0xa0] ss:$16 sps:$4 sm:$0xff]  }
 0x1c0   : > { %1110 = vmatprep.subr.bf16.mxu0 %v1721_v50  ;;  %1151 = vmatprep.subr.bf16.mxu1 %v1738_v59  ;;  %v1742_v3 = vld [vmem:[%s2407_s11 + $0xc4] ss:$16 sps:$4 sm:$0xff]   ;;  %v1753_v4 = vld [vmem:[%s2407_s11 + $0x88] ss:$16 sps:$4 sm:$0xff]   ;;  %v1756_v5 = vld [vmem:[%s2407_s11 + $0xac] ss:$16 sps:$4 sm:$0xff]   ;;  %v1194_v50 = vlaneseq }
 0x1c1   : > { %v1746_v6 = vld [vmem:[%s2407_s11 + $0xc0] ss:$16 sps:$4 sm:$0xff]   ;;  %v1748_v7 = vld [vmem:[%s2407_s11 + $0xe4] ss:$16 sps:$4 sm:$0xff]   ;;  %v1759_v8 = vld [vmem:[%s2407_s11 + $0xa8] ss:$16 sps:$4 sm:$0xff]  }
 0x1c2   : > { %v1762_v9 = vld [vmem:[%s2407_s11 + $0xcc] ss:$16 sps:$4 sm:$0xff]   ;;  %v1752_v10 = vld [vmem:[%s2407_s11 + $0xe0] ss:$16 sps:$4 sm:$0xff]   ;;  %v1754_v11 = vld [vmem:[%s2407_s11 + $0x104] ss:$16 sps:$4 sm:$0xff]  }
 0x1c3   : > { %1111 = vmatpush1.bf16.msra.mxu0 %v1723_v53  ;;  %1152 = vmatpush1.bf16.msra.mxu1 %v1741_v60  ;;  %v1765_v12 = vld [vmem:[%s2407_s11 + $0xc8] ss:$16 sps:$4 sm:$0xff]   ;;  %v1768_v13 = vld [vmem:[%s2407_s11 + $0xec] ss:$16 sps:$4 sm:$0xff]   ;;  %v1758_v14 = vld [vmem:[%s2407_s11 + $0x100] ss:$16 sps:$4 sm:$0xff]  }
 0x1c4   : > { %1112 = vmatprep.subr.bf16.mxu0 %v1724_v54  ;;  %1153 = vmatprep.subr.bf16.mxu1 %v1744_v61  ;;  %v1760_v15 = vld [vmem:[%s2407_s11 + $0x124] ss:$16 sps:$4 sm:$0xff]   ;;  %v1771_v16 = vld [vmem:[%s2407_s11 + $0xe8] ss:$16 sps:$4 sm:$0xff]   ;;  %v1774_v17 = vld [vmem:[%s2407_s11 + $0x10c] ss:$16 sps:$4 sm:$0xff]  }
 0x1c5   : > { %v1764_v18 = vld [vmem:[%s2407_s11 + $0x120] ss:$16 sps:$4 sm:$0xff]   ;;  %v1766_v19 = vld [vmem:[%s2407_s11 + $0x144] ss:$16 sps:$4 sm:$0xff]   ;;  %v1777_v20 = vld [vmem:[%s2407_s11 + $0x108] ss:$16 sps:$4 sm:$0xff]  }
 0x1c6   : > { %v1780_v21 = vld [vmem:[%s2407_s11 + $0x12c] ss:$16 sps:$4 sm:$0xff]   ;;  %v719_v22 = vld [vmem:[#allocation2 + $0x8] sm:$0xff]  ;;  %v1783_v26 = vld [vmem:[%s2407_s11 + $0x128] ss:$16 sps:$4 sm:$0xff]   ;;  %v1195_v51 = vshrl.u32 %v1194_v50, 7 }
 0x1c7   : > { %1113 = vmatpush1.bf16.msra.mxu0 %v1728_v57  ;;  %1154 = vmatpush1.bf16.msra.mxu1 %v1747_v0  ;;  %v1770_v23 = vld [vmem:[%s2407_s11 + $0x140] ss:$16 sps:$4 sm:$0xff]   ;;  %v721_v24 = vpack.c.bf16 %v719_v22, %v719_v22  ;;  %v1772_v25 = vld [vmem:[%s2407_s11 + $0x164] ss:$16 sps:$4 sm:$0xff]   ;;  %v1786_v27 = vld [vmem:[%s2407_s11 + $0x14c] ss:$16 sps:$4 sm:$0xff]  }
 0x1c8   : > { %1114 = vmatprep.subr.bf16.mxu0 %v1730_v58  ;;  %1155 = vmatprep.subr.bf16.mxu1 %v1750_v1  ;;  %v1776_v28 = vld [vmem:[%s2407_s11 + $0x160] ss:$16 sps:$4 sm:$0xff]   ;;  %v1778_v29 = vld [vmem:[%s2407_s11 + $0x184] ss:$16 sps:$4 sm:$0xff]   ;;  %v1789_v30 = vld [vmem:[%s2407_s11 + $0x148] ss:$16 sps:$4 sm:$0xff]  }
 0x1c9   : > { %1138 = vmatprep.mubr.bf16.mxu0 %v721_v24  ;;  %1179 = vmatprep.mubr.bf16.mxu1 %v721_v24  ;;  %v1792_v31 = vld [vmem:[%s2407_s11 + $0x16c] ss:$16 sps:$4 sm:$0xff]   ;;  %v1782_v32 = vld [vmem:[%s2407_s11 + $0x180] ss:$16 sps:$4 sm:$0xff]   ;;  %v1784_v33 = vld [vmem:[%s2407_s11 + $0x1a4] ss:$16 sps:$4 sm:$0xff]  }
 0x1ca   : > { %v1795_v34 = vld [vmem:[%s2407_s11 + $0x168] ss:$16 sps:$4 sm:$0xff]   ;;  %v1798_v35 = vld [vmem:[%s2407_s11 + $0x18c] ss:$16 sps:$4 sm:$0xff]   ;;  %v1788_v36 = vld [vmem:[%s2407_s11 + $0x1a0] ss:$16 sps:$4 sm:$0xff]  }
 0x1cb   : > { %1115 = vmatpush1.bf16.msra.mxu0 %v1734_v62  ;;  %1156 = vmatpush1.bf16.msra.mxu1 %v1753_v4  ;;  %v1790_v37 = vld [vmem:[%s2407_s11 + $0x1c4] ss:$16 sps:$4 sm:$0xff]   ;;  %v1801_v38 = vld [vmem:[%s2407_s11 + $0x188] ss:$16 sps:$4 sm:$0xff]   ;;  %v1802_v39 = vld [vmem:[%s2407_s11 + $0x1ac] ss:$16 sps:$4 sm:$0xff]  }
 0x1cc   : > { %1116 = vmatprep.subr.bf16.mxu0 %v1736_v63  ;;  %1157 = vmatprep.subr.bf16.mxu1 %v1756_v5  ;;  %v1794_v40 = vld [vmem:[%s2407_s11 + $0x1c0] ss:$16 sps:$4 sm:$0xff]   ;;  %v1796_v41 = vld [vmem:[%s2407_s11 + $0x1e4] ss:$16 sps:$4 sm:$0xff]   ;;  %v1804_v42 = vld [vmem:[%s2407_s11 + $0x1a8] ss:$16 sps:$4 sm:$0xff]  }
 0x1cd   : > { %v1805_v43 = vld [vmem:[%s2407_s11 + $0x1cc] ss:$16 sps:$4 sm:$0xff]   ;;  %v1800_v44 = vld [vmem:[%s2407_s11 + $0x1e0] ss:$16 sps:$4 sm:$0xff]   ;;  %v1807_v46 = vld [vmem:[%s2407_s11 + $0x1c8] ss:$16 sps:$4 sm:$0xff]  }
 0x1ce   : > { %v718_v45 = vld [vmem:[#allocation2] sm:$0xff]  ;;  %v1196_v52 = vsub.s32 0, %v1195_v51  ;;  %v1200_v54 = vsub.s32 1, %v1195_v51  ;;  %v714_v55 = vld [vmem:[#allocation3] sm:$0xff]  ;;  %v715_v57 = vld [vmem:[#allocation3 + $0x8] sm:$0xff]  ;;  %v1208_v62 = vsub.s32 3, %v1195_v51 }
 0x1cf   : > { %1117 = vmatpush1.bf16.msra.mxu0 %v1740_v2  ;;  %1158 = vmatpush1.bf16.msra.mxu1 %v1759_v8  ;;  %v1808_v47 = vld [vmem:[%s2407_s11 + $0x1ec] ss:$16 sps:$4 sm:$0xff]   ;;  %v720_v48 = vpack.c.bf16 %v718_v45, %v718_v45  ;;  %v1810_v49 = vld [vmem:[%s2407_s11 + $0x1e8] ss:$16 sps:$4 sm:$0xff]   ;;  %v717_v4 = vld [vmem:[#allocation3 + $0x18] sm:$0xff]  ;;  %s1575_s15 = sshll.u32 %s2154_s28, 7 }
 0x1d0   : > { %1118 = vmatprep.subr.bf16.mxu0 %v1742_v3  ;;  %1159 = vmatprep.subr.bf16.mxu1 %v1762_v9  ;;  %v1192_v53 = vld [vmem:[%s2404_s19] sm:$0xf]  ;;  %v1204_v9 = vsub.s32 2, %v1195_v51  ;;  %s1278_s2 = sshll.u32 %s413_s30, 4  ;;  %s2489_s17 = scalar_lea.hbm %s2577_s7, %s1575_s15  ;;  %s2491_s2 = int_to_ptr.vmem [resolvable:$true] %s1278_s2 }
 0x1d1   : > { %v1197_v56 = vrot.slane %v1192_v53, %v1196_v52  ;;  %v1201_v59 = vrot.slane %v1192_v53, %v1200_v54  ;;  %s1252_s29 = scalar_lea.sflag [#allocation14], %s2388_s22  ;;  %s1973_s8 = scalar_lea.vmem %s2491_s2, 128 }
 0x1d2   : > { %p1974_p5 = scmp.ne.s32.totalorder %s2491_s2, %s1973_s8  ;;  %p2627_p11 = scmp.ne.s32.totalorder %s2600_s12, 0 }
 0x1d3   : > { %1119 = vmatpush1.bf16.msra.mxu0 %v1746_v6  ;;  %1160 = vmatpush1.bf16.msra.mxu1 %v1765_v12  ;;  %s2091_s26 = smov [#allocation13]  }
 0x1d4   : > { %1120 = vmatprep.subr.bf16.mxu0 %v1748_v7  ;;  %1161 = vmatprep.subr.bf16.mxu1 %v1768_v13  ;;  %v1209_v7 = vrot.slane %v1192_v53, %v1208_v62  ;;  %p1975_p13 = pnand %p1974_p5, %p2627_p11  ;;  %s1977_s9 = sshll.u32 %s2091_s26, 4  ;;  %s1978_s9 = int_to_ptr.vmem [resolvable:$false] %s1977_s9 }
 0x1d5   : > { %s1979_s20 = scalar_lea.vmem %s1978_s9, 256  ;;  %p1980_p0 = scmp.lt.s32.totalorder %s2491_s2, %s1978_s9 }
 0x1d6   : > { %p1976_p2 = pneg %p1975_p13  ;;  %p1981_p4 = scmp.lt.s32.totalorder %s1979_s20, %s1973_s8 }
 0x1d7   : > { %1121 = vmatpush1.bf16.msra.mxu0 %v1752_v10  ;;  %1162 = vmatpush1.bf16.msra.mxu1 %v1771_v16 }
 0x1d8   : > { %1122 = vmatprep.subr.bf16.mxu0 %v1754_v11  ;;  %1163 = vmatprep.subr.bf16.mxu1 %v1774_v17  ;;  %v716_v11 = vld [vmem:[#allocation3 + $0x10] sm:$0xff]  ;;  %v1205_v17 = vrot.slane %v1192_v53, %v1204_v9  ;;  %p1982_p3 = por %p1981_p4, %p1980_p0 }
 0x1da   : > { %p1983_p6 = pnand %p1982_p3, %p1976_p2 }
 0x1db   : > { %1123 = vmatpush1.bf16.msra.mxu0 %v1758_v14  ;;  %1164 = vmatpush1.bf16.msra.mxu1 %v1777_v20 }
 0x1dc   : > { %1124 = vmatprep.subr.bf16.mxu0 %v1760_v15  ;;  %1165 = vmatprep.subr.bf16.mxu1 %v1780_v21 }
 0x1df   : > { %1125 = vmatpush1.bf16.msra.mxu0 %v1764_v18  ;;  %1166 = vmatpush1.bf16.msra.mxu1 %v1783_v26  ;;  %v1218_v26 = vld [vmem:[%s355_s23] sm:$0xff] }
 0x1e0   : > { %1126 = vmatprep.subr.bf16.mxu0 %v1766_v19  ;;  %1167 = vmatprep.subr.bf16.mxu1 %v1786_v27 }
 0x1e3   : > { %1127 = vmatpush1.bf16.msra.mxu0 %v1770_v23  ;;  %1168 = vmatpush1.bf16.msra.mxu1 %v1789_v30 }
 0x1e4   : > { %1128 = vmatprep.subr.bf16.mxu0 %v1772_v25  ;;  %1169 = vmatprep.subr.bf16.mxu1 %v1792_v31 }
 0x1e7   : > { %1129 = vmatpush1.bf16.msra.mxu0 %v1776_v28  ;;  %1170 = vmatpush1.bf16.msra.mxu1 %v1795_v34 }
 0x1e8   : > { %1130 = vmatprep.subr.bf16.mxu0 %v1778_v29  ;;  %1171 = vmatprep.subr.bf16.mxu1 %v1798_v35 }
 0x1eb   : > { %1131 = vmatpush1.bf16.msra.mxu0 %v1782_v32  ;;  %1172 = vmatpush1.bf16.msra.mxu1 %v1801_v38 }
 0x1ec   : > { %1132 = vmatprep.subr.bf16.mxu0 %v1784_v33  ;;  %1173 = vmatprep.subr.bf16.mxu1 %v1802_v39 }
 0x1ef   : > { %1133 = vmatpush1.bf16.msra.mxu0 %v1788_v36  ;;  %1174 = vmatpush1.bf16.msra.mxu1 %v1804_v42 }
 0x1f0   : > { %1134 = vmatprep.subr.bf16.mxu0 %v1790_v37  ;;  %1175 = vmatprep.subr.bf16.mxu1 %v1805_v43 }
 0x1f3   : > { %1135 = vmatpush1.bf16.msra.mxu0 %v1794_v40  ;;  %1176 = vmatpush1.bf16.msra.mxu1 %v1807_v46 }
 0x1f4   : > { %1136 = vmatprep.subr.bf16.mxu0 %v1796_v41  ;;  %1177 = vmatprep.subr.bf16.mxu1 %v1808_v47 }
 0x1f7   : > { %1137 = vmatpush1.bf16.msra.mxu0 %v1800_v44  ;;  %1178 = vmatpush1.bf16.msra.mxu1 %v1810_v49 }
 0x1fa   : > { %1139 = vmatmul.mubr.bf16.vlgmr.msra.gmra.mrb[0].mxu0 %v720_v48  ;;  %1180 = vmatmul.mubr.bf16.vlgmr.msra.gmra.mrb[0].mxu1 %v720_v48 }
 0x2cd   : > { %v1140_v58 = vpop.f32.mrb[0].mxu0  ;;  %v1181_v6 = vpop.f32.mrb[0].mxu1 }
 0x2ce   : > { %v1188_v60 = vadd.f32 %v1140_v58, %v714_v55  ;;  %v1142_v61 = vpop.f32.mrb[1].mxu0  ;;  %v1183_v10 = vpop.f32.mrb[1].mxu1  ;;  %v1190_v16 = vadd.f32 %v1181_v6, %v716_v11 }
 0x2cf   : > { %v1189_v63 = vadd.f32 %v1142_v61, %v715_v57  ;;  %v1144_v0 = vpop.f32.mrb[2].mxu0  ;;  %v1191_v12 = vadd.f32 %v1183_v10, %v717_v4  ;;  %v1185_v13 = vpop.f32.mrb[2].mxu1 }
 0x2d0   : > { %v1214_v1 = vadd.f32 %v1197_v56, %v1188_v60  ;;  %v1145_v2 = vpop.f32.mrb[3].mxu0  ;;  %v1186_v14 = vpop.f32.mrb[3].mxu1  ;;  %v1216_v19 = vadd.f32 %v1205_v17, %v1190_v16 }
 0x2d1   : > { %v1215_v3 = vadd.f32 %v1201_v59, %v1189_v63  ;;  %v1217_v15 = vadd.f32 %v1209_v7, %v1191_v12 }
 0x2d2   : > { %v1570_v5 = vmul.f32 -1.442695, %v1214_v1 }
 0x2d3   : > { %v1571_v8 = vmul.f32 -1.442695, %v1215_v3  ;;  %v1572_v18 = vmul.f32 -1.442695, %v1217_v15 }
 0x2d4   : > { %1811 = vpow2.f32 %v1570_v5 }
 0x2d5   : > { %1813 = vpow2.f32 %v1571_v8 }
 0x2d6   : > { %1815 = vpow2.f32 %v1572_v18 }
 0x2d7   : > { %1817 = vtanh.f32 %v1216_v19 }
 0x2de   : > { %v1812_v20 = vpop.eup %1811 }
 0x2df   : > { %v1814_v21 = vpop.eup %1813  ;;  %v1222_v22 = vadd.f32 1.0, %v1812_v20 }
 0x2e0   : > { %v1228_v23 = vadd.f32 1.0, %v1814_v21  ;;  %v1816_v24 = vpop.eup %1815 }
 0x2e1   : > { %1819 = vrcp.f32 %v1222_v22  ;;  %v1818_v25 = vpop.eup %1817  ;;  %v1235_v28 = vadd.f32 1.0, %v1816_v24 }
 0x2e2   : > { %1821 = vrcp.f32 %v1228_v23 }
 0x2e3   : > { %1823 = vrcp.f32 %v1235_v28 }
 0x2eb   : > { %v1820_v27 = vpop.eup %1819 }
 0x2ec   : > { %v1822_v29 = vpop.eup %1821  ;;  %v1239_v30 = vmul.f32 %v1820_v27, %v1818_v25 }
 0x2ed   : > { %v1238_v31 = vmul.f32 %v1822_v29, %v1218_v26 }
 0x2ef   : > { %v1240_v32 = vadd.f32 %v1239_v30, %v1238_v31 }
 0x2f1   : > { %1244 = vst [vmem:[%s413_s30] sm:$0xff] %v1240_v32  ;;  %1825 = vtanh.f32 %v1240_v32 }
 0x2f2   : > { %1986 = shalt.err (!%p1983_p6)
}
 0x2f3   : > { %s1987_s21 = scalar_lea.hbm %s2489_s17, 128  ;;  %s1991_s23 = scalar_lea.hbm %s2577_s7, 256 }
 0x2f4   : > { %p1988_p12 = scmp.ne.s32.totalorder %s2489_s17, %s1987_s21  ;;  %p1992_p10 = scmp.lt.u32.totalorder %s2489_s17, %s2577_s7 }
 0x2f5   : > { %p1993_p9 = scmp.lt.u32.totalorder %s1991_s23, %s1987_s21  ;;  %p1995_p5 = scmp.lt.u32.totalorder %s1987_s21, %s2489_s17 }
 0x2f6   : > { %p1989_p7 = pnand %p1988_p12, %p2627_p11 }
 0x2f7   : > { %p1994_p1 = por %p1993_p9, %p1992_p10 }
 0x2f8   : > { %p1990_p8 = pneg %p1989_p7 }
 0x2f9   : > { %p1996_p13 = por %p1995_p5, %p1994_p1 }
 0x2fb   : > { %p1997_p2 = pnand %p1996_p13, %p1990_p8 }
 0x2fd   : > { %2000 = shalt.err (!%p1997_p2)
}
 0x2fe   : > { %1595 = dma.vmem_to_hbm [thread:$0]  (%p2627_p11), %s2491_s2, 128, %s2489_s17, %s1252_s29   ;;  %v1824_v33 = vpop.eup %1823 }
 0x2ff   : > { %s1265_s16 = sshll.u32 %s406_s10, 4  ;;  %v1826_v34 = vpop.eup %1825  ;;  %s2524_s26 = scalar_lea.hbm %s2576_s6, %s1575_s15  ;;  %s2526_s16 = int_to_ptr.vmem [resolvable:$true] %s1265_s16 }
 0x300   : > { %v1242_v35 = vmul.f32 %v1826_v34, %v1824_v33  ;;  %s1247_s2 = scalar_lea.sflag [#allocation6], %s2388_s22  ;;  %s2001_s17 = scalar_lea.vmem %s2526_s16, 128 }
 0x301   : > { %p2002_p0 = scmp.ne.s32.totalorder %s2526_s16, %s2001_s17  ;;  %s2092_s28 = smov [#allocation12]  }
 0x302   : > { %1243 = vst [vmem:[%s406_s10] sm:$0xff] %v1242_v35  ;;  %1245 = vst [vmem:[#allocation2] sm:$0xff] %v1242_v35  ;;  %s2005_s29 = sshll.u32 %s2092_s28, 4  ;;  %s2006_s29 = int_to_ptr.vmem [resolvable:$false] %s2005_s29 }
 0x303   : > { %p2003_p4 = pnand %p2002_p0, %p2627_p11  ;;  %s2007_s9 = scalar_lea.vmem %s2006_s29, 256 }
 0x304   : > { %p2008_p6 = scmp.lt.s32.totalorder %s2526_s16, %s2006_s29  ;;  %p2009_p12 = scmp.lt.s32.totalorder %s2007_s9, %s2001_s17 }
 0x305   : > { %p2004_p3 = pneg %p2003_p4 }
 0x306   : > { %p2010_p7 = por %p2009_p12, %p2008_p6 }
 0x308   : > { %p2011_p8 = pnand %p2010_p7, %p2004_p3 }
 0x30a   : > { %2014 = shalt.err (!%p2011_p8)
}
 0x30b   : > { %s2015_s22 = scalar_lea.hbm %s2524_s26, 128  ;;  %s2019_s15 = scalar_lea.hbm %s2576_s6, 256 }
 0x30c   : > { %p2016_p10 = scmp.ne.s32.totalorder %s2524_s26, %s2015_s22  ;;  %p2020_p5 = scmp.lt.u32.totalorder %s2524_s26, %s2576_s6 }
 0x30d   : > { %p2021_p13 = scmp.lt.u32.totalorder %s2019_s15, %s2015_s22  ;;  %p2023_p0 = scmp.lt.u32.totalorder %s2015_s22, %s2524_s26 }
 0x30e   : > { %p2017_p9 = pnand %p2016_p10, %p2627_p11 }
 0x30f   : > { %p2022_p2 = por %p2021_p13, %p2020_p5 }
 0x310   : > { %p2018_p1 = pneg %p2017_p9 }
 0x311   : > { %p2024_p4 = por %p2023_p0, %p2022_p2 }
 0x313   : > { %p2025_p3 = pnand %p2024_p4, %p2018_p1 }
 0x315   : > { %2028 = shalt.err (!%p2025_p3)
}
 0x316   : > { %1594 = dma.vmem_to_hbm [thread:$0]  (%p2627_p11), %s2526_s16, 128, %s2524_s26, %s1247_s2  }
 0x317 PF: > { %s1290_s18 = sand.u32 1, %s2067_s24   ;;  %p2628_p6 = scmp.ne.s32.totalorder %s2601_s13, 0 }
 0x318   : > { %p2629_p12 = scmp.ge.s32.totalorder %s2079_s27, 2  ;;  %s1291_s19 = scalar_lea.sflag [#allocation6], %s1290_s18 }
 0x31a   : > { %p1616_p7 = pnand %p2629_p12, %p2628_p6 }
 0x31c   : > { %2058 = dma.done.wait (!%p1616_p7), %s1291_s19, 128  }
 0x31d   : > { %2060 = vsyncadd (!%p1616_p7), %s1291_s19, 4294967168  ;;  %s1300_s23 = scalar_lea.sflag [#allocation14], %s1290_s18 }
 0x31e   : > { %2062 = dma.done.wait (!%p1616_p7), %s1300_s23, 128  }
 0x31f   : > { %2064 = vsyncadd (!%p1616_p7), %s1300_s23, 4294967168  ;;  %s2630_s27 = sld [smem:[#allocation21_spill]]  ;;  %s2631_s12 = sld [smem:[#allocation20_spill]] }
 0x320   : > { %s2632_s26 = sld [smem:[#allocation22_spill]]  ;;  %s2633_s24 = smov %s2071_s25 }
 0x325   : > { %p23_p11 = scmp.ge.s32.totalorder %s2630_s27, 4   ;;  %s2634_s25 = smov %s2631_s12 }
 0x327   :  { %25 = sbr.rel (!%p23_p11) target bundleno = 10 (0xa), region = 146 }
 0x32e   :  { %1305 = vsyncpa [#allocation5], 1 }
 0x32f   :  { %1307 = vsyncpa [#allocation5 + $0x1], 1 }
 0x330   :  { %1308 = vsyncpa [#allocation8], 1 }
 0x331   :  { %1309 = vsyncpa [#allocation6], 1 }
 0x332   :  { %1311 = vsyncpa [#allocation6 + $0x1], 1 }
 0x333   :  { %1312 = vsyncpa [#allocation14], 1 }
 0x334   :  { %1314 = vsyncpa [#allocation14 + $0x1], 1 }

</bundles_post_ra>
